<compile_context>
chip_gen: v7x
topology: tpu7x:2x2x1
jax: 0.10.0
libtpu: 0.0.40
codegen_flags: <defaults>
</compile_context>

<pallas_src>
import jax
import jax.numpy as jnp
from jax.experimental import pallas as pl
from jax.experimental.pallas import tpu as pltpu

HIDDEN = 256
NEG_SLOPE = 0.01          # F.leaky_relu default negative_slope
LANE = 128
SUBLANE = 8


def _leaky_relu(x):
    # For 0 < slope < 1, maximum(x, slope*x) == leaky_relu(x): pure 2-op VALU, no select.
    return jnp.maximum(x, NEG_SLOPE * x)


def dqn_pacman_kernel(x_ref, w1_ref, b1_ref, w2_ref, b2_ref, w3_ref, b3_ref, out_ref):
    # x tile: [TB, in_features] f32.  Weights: bf16 [in, out].  Biases: f32 [1, out].
    x = x_ref[...].astype(jnp.bfloat16)

    # fc1 + leaky_relu  (bf16 MXU matmul, f32 accumulate, f32 activation -> v5e-safe)
    h1 = jnp.dot(x, w1_ref[...], preferred_element_type=jnp.float32) + b1_ref[...]
    h1 = _leaky_relu(h1).astype(jnp.bfloat16)

    # fc2 + leaky_relu
    h2 = jnp.dot(h1, w2_ref[...], preferred_element_type=jnp.float32) + b2_ref[...]
    h2 = _leaky_relu(h2).astype(jnp.bfloat16)

    # fc3 (no activation); lane-dense padded width, stored bf16 (halves output HBM bytes)
    y = jnp.dot(h2, w3_ref[...], preferred_element_type=jnp.float32) + b3_ref[...]
    out_ref[...] = y.astype(out_ref.dtype)


def prepare_params(params):
    """One-time parameter preparation (do at init / checkpoint load, NOT per forward).

    - transpose PyTorch [out, in] weights -> [in, out]
    - cast weights to bf16 (biases stay f32)
    - reshape biases to [1, out] rows
    - zero-pad fc3 output width up to a multiple of 128 lanes
      (do NOT pad beyond that: extra lanes would only inflate the dominant output write)
    """
    out_size = params["w3"].shape[0]
    out_pad = ((out_size + LANE - 1) // LANE) * LANE

    w1 = params["w1"].T.astype(jnp.bfloat16)                      # [in, 256]
    w2 = params["w2"].T.astype(jnp.bfloat16)                      # [256, 256]
    w3 = params["w3"].T.astype(jnp.bfloat16)                      # [256, out]
    w3 = jnp.pad(w3, ((0, 0), (0, out_pad - out_size)))           # [256, out_pad]

    b1 = params["b1"].astype(jnp.float32).reshape(1, -1)
    b2 = params["b2"].astype(jnp.float32).reshape(1, -1)
    b3 = jnp.pad(params["b3"].astype(jnp.float32),
                 (0, out_pad - out_size)).reshape(1, -1)

    return {"w1": w1, "b1": b1, "w2": w2, "b2": b2, "w3": w3, "b3": b3,
            "out_size": out_size, "out_pad": out_pad}


def dqn_pacman_forward(x, prep, *, batch_tile=512):
    """x: [B, input_size] f32.  prep: output of prepare_params().  Returns [B, out_size] f32."""
    B, in_features = x.shape
    out_size = prep["out_size"]
    out_pad = prep["out_pad"]

    # Batch tile: sublane-aligned, capped at batch_tile.  For large B snap to a
    # multiple of 256 so the MXU M-dim fills completely on v6e/v7x.
    b_aligned = ((B + SUBLANE - 1) // SUBLANE) * SUBLANE
    tb = min(batch_tile, b_aligned)
    if tb >= 256:
        tb = (tb // 256) * 256
    grid = (pl.cdiv(B, tb),)
    rows = grid[0] * tb

    flops = 2 * rows * (in_features * HIDDEN + HIDDEN * HIDDEN + HIDDEN * out_pad)
    bytes_accessed = (
        B * in_features * 4
        + sum(int(prep[k].size) * prep[k].dtype.itemsize
              for k in ("w1", "w2", "w3", "b1", "b2", "b3"))
        + B * out_pad * 2                                  # bf16 output
    )

    resident = lambda i: (0, 0)   # weights/biases stay in VMEM across all grid steps

    out = pl.pallas_call(
        dqn_pacman_kernel,
        out_shape=jax.ShapeDtypeStruct((B, out_pad), jnp.bfloat16),
        grid=grid,
        in_specs=[
            pl.BlockSpec((tb, in_features), lambda i: (i, 0)),   # x: tiled over batch
            pl.BlockSpec((in_features, HIDDEN), resident),       # w1
            pl.BlockSpec((1, HIDDEN), resident),                 # b1
            pl.BlockSpec((HIDDEN, HIDDEN), resident),            # w2
            pl.BlockSpec((1, HIDDEN), resident),                 # b2
            pl.BlockSpec((HIDDEN, out_pad), resident),           # w3 (lane-padded)
            pl.BlockSpec((1, out_pad), resident),                # b3 (lane-padded)
        ],
        out_specs=pl.BlockSpec((tb, out_pad), lambda i: (i, 0)),
        compiler_params=pltpu.CompilerParams(
            dimension_semantics=("parallel",)),
        cost_estimate=pl.CostEstimate(
            flops=flops, transcendentals=0, bytes_accessed=bytes_accessed),
    )(x, prep["w1"], prep["b1"], prep["w2"], prep["b2"], prep["w3"], prep["b3"])

    # Cheap narrow slice of the lane-padded bf16 buffer back to the module's shape.
    # (Consumers that can work on the padded bf16 buffer directly should take `out` as-is.)
    return out[:, :out_size].astype(jnp.float32)


def init_params(key, input_size, output_size):
    """Deterministic synthetic init matching nn.Linear shapes (PyTorch [out, in])."""
    ks = jax.random.split(key, 6)

    def uniform(k, shape, fan_in):
        bound = 1.0 / jnp.sqrt(jnp.float32(fan_in))
        return jax.random.uniform(k, shape, jnp.float32, -bound, bound)

    return {
        "w1": uniform(ks[0], (HIDDEN, input_size), input_size),
        "b1": uniform(ks[1], (HIDDEN,), input_size),
        "w2": uniform(ks[2], (HIDDEN, HIDDEN), HIDDEN),
        "b2": uniform(ks[3], (HIDDEN,), HIDDEN),
        "w3": uniform(ks[4], (output_size, HIDDEN), HIDDEN),
        "b3": uniform(ks[5], (output_size,), HIDDEN),
    }


def reference_forward(x, params):
    """Pure-JAX f32 reference mirroring the PyTorch module."""
    h1 = _leaky_relu(x @ params["w1"].T + params["b1"])
    h2 = _leaky_relu(h1 @ params["w2"].T + params["b2"])
    return h2 @ params["w3"].T + params["b3"]


if __name__ == "__main__":
    input_size = 32    # flattened Pacman state features
    output_size = 8    # action-value outputs
    batch = 2

    key = jax.random.PRNGKey(0)
    k_x, k_p = jax.random.split(key)
    x = jax.random.normal(k_x, (batch, input_size), jnp.float32)
    params = init_params(k_p, input_size, output_size)

    # One-time parameter prep (transpose / bf16 cast / lane padding).
    prep = prepare_params(params)

    out = dqn_pacman_forward(x, prep)
    out = jax.block_until_ready(out)

    ref = reference_forward(x, params)
    assert out.shape == (batch, output_size)
    # Weights and the stored output are bf16 (f32 accumulation), so tolerances vs
    # the pure-f32 reference are loosened accordingly.
    assert jnp.allclose(out, ref, atol=2e-2, rtol=2e-2), "mismatch vs reference"

    print("KERNEL_OK")
</pallas_src>

<mosaic_0001>
module attributes {stable_mosaic.version = 11 : i64} {
  func.func @dqn_pacman_kernel(%arg0: i32, %arg1: memref<8x32xf32, #tpu.memory_space<vmem>>, %arg2: memref<32x256xbf16, #tpu.memory_space<vmem>>, %arg3: memref<1x256xf32, #tpu.memory_space<vmem>>, %arg4: memref<256x256xbf16, #tpu.memory_space<vmem>>, %arg5: memref<1x256xf32, #tpu.memory_space<vmem>>, %arg6: memref<256x128xbf16, #tpu.memory_space<vmem>>, %arg7: memref<1x128xf32, #tpu.memory_space<vmem>>, %arg8: memref<8x128xbf16, #tpu.memory_space<vmem>>) attributes {dimension_semantics = [#tpu.dimension_semantics<parallel>], iteration_bounds = array<i64: 1>, scalar_prefetch = 0 : i64, scratch_operands = 0 : i64, tpu.core_type = #tpu.core_type<tc>, window_params = [{transform_indices = @transform_0, window_bounds = array<i64: 8, 32>}, {pipeline_mode = #tpu.pipeline_mode<synchronous>, transform_indices = @transform_1, window_bounds = array<i64: 32, 256>}, {pipeline_mode = #tpu.pipeline_mode<synchronous>, transform_indices = @transform_2, window_bounds = array<i64: 1, 256>}, {pipeline_mode = #tpu.pipeline_mode<synchronous>, transform_indices = @transform_3, window_bounds = array<i64: 256, 256>}, {pipeline_mode = #tpu.pipeline_mode<synchronous>, transform_indices = @transform_4, window_bounds = array<i64: 1, 256>}, {pipeline_mode = #tpu.pipeline_mode<synchronous>, transform_indices = @transform_5, window_bounds = array<i64: 256, 128>}, {pipeline_mode = #tpu.pipeline_mode<synchronous>, transform_indices = @transform_6, window_bounds = array<i64: 1, 128>}, {transform_indices = @transform_7, window_bounds = array<i64: 8, 128>}]} {
    %c0 = arith.constant 0 : index
    %c0_0 = arith.constant 0 : index
    %0 = vector.load %arg1[%c0, %c0_0] : memref<8x32xf32, #tpu.memory_space<vmem>>, vector<8x32xf32>
    %1 = arith.truncf %0 : vector<8x32xf32> to vector<8x32xbf16>
    %c0_1 = arith.constant 0 : index
    %c0_2 = arith.constant 0 : index
    %2 = vector.load %arg2[%c0_1, %c0_2] : memref<32x256xbf16, #tpu.memory_space<vmem>>, vector<32x256xbf16>
    %cst = arith.constant dense<0.000000e+00> : vector<8x256xf32>
    %3 = tpu.matmul %1, %2, %cst {dimension_numbers = #tpu.dot_dimension_numbers<[1], [0], [0], [1], [0, 0, 1, 1], [], []>} : vector<8x32xbf16>, vector<32x256xbf16>, vector<8x256xf32> -> vector<8x256xf32>
    %c0_3 = arith.constant 0 : index
    %c0_4 = arith.constant 0 : index
    %4 = vector.load %arg3[%c0_3, %c0_4] : memref<1x256xf32, #tpu.memory_space<vmem>>, vector<1x256xf32>
    %5 = vector.broadcast %4 : vector<1x256xf32> to vector<8x256xf32>
    %6 = arith.addf %3, %5 : vector<8x256xf32>
    %cst_5 = arith.constant 0.00999999977 : f32
    %7 = vector.broadcast %cst_5 : f32 to vector<8x256xf32>
    %8 = arith.mulf %7, %6 : vector<8x256xf32>
    %9 = arith.maximumf %6, %8 : vector<8x256xf32>
    %10 = arith.truncf %9 : vector<8x256xf32> to vector<8x256xbf16>
    %c0_6 = arith.constant 0 : index
    %c0_7 = arith.constant 0 : index
    %11 = vector.load %arg4[%c0_6, %c0_7] : memref<256x256xbf16, #tpu.memory_space<vmem>>, vector<256x256xbf16>
    %cst_8 = arith.constant dense<0.000000e+00> : vector<8x256xf32>
    %12 = tpu.matmul %10, %11, %cst_8 {dimension_numbers = #tpu.dot_dimension_numbers<[1], [0], [0], [1], [0, 0, 1, 1], [], []>} : vector<8x256xbf16>, vector<256x256xbf16>, vector<8x256xf32> -> vector<8x256xf32>
    %c0_9 = arith.constant 0 : index
    %c0_10 = arith.constant 0 : index
    %13 = vector.load %arg5[%c0_9, %c0_10] : memref<1x256xf32, #tpu.memory_space<vmem>>, vector<1x256xf32>
    %14 = vector.broadcast %13 : vector<1x256xf32> to vector<8x256xf32>
    %15 = arith.addf %12, %14 : vector<8x256xf32>
    %cst_11 = arith.constant 0.00999999977 : f32
    %16 = vector.broadcast %cst_11 : f32 to vector<8x256xf32>
    %17 = arith.mulf %16, %15 : vector<8x256xf32>
    %18 = arith.maximumf %15, %17 : vector<8x256xf32>
    %19 = arith.truncf %18 : vector<8x256xf32> to vector<8x256xbf16>
    %c0_12 = arith.constant 0 : index
    %c0_13 = arith.constant 0 : index
    %20 = vector.load %arg6[%c0_12, %c0_13] : memref<256x128xbf16, #tpu.memory_space<vmem>>, vector<256x128xbf16>
    %cst_14 = arith.constant dense<0.000000e+00> : vector<8x128xf32>
    %21 = tpu.matmul %19, %20, %cst_14 {dimension_numbers = #tpu.dot_dimension_numbers<[1], [0], [0], [1], [0, 0, 1, 1], [], []>} : vector<8x256xbf16>, vector<256x128xbf16>, vector<8x128xf32> -> vector<8x128xf32>
    %c0_15 = arith.constant 0 : index
    %c0_16 = arith.constant 0 : index
    %22 = vector.load %arg7[%c0_15, %c0_16] : memref<1x128xf32, #tpu.memory_space<vmem>>, vector<1x128xf32>
    %23 = vector.broadcast %22 : vector<1x128xf32> to vector<8x128xf32>
    %24 = arith.addf %21, %23 : vector<8x128xf32>
    %25 = arith.truncf %24 : vector<8x128xf32> to vector<8x128xbf16>
    %c0_17 = arith.constant 0 : index
    %c0_18 = arith.constant 0 : index
    %26 = vector.load %arg8[%c0_17, %c0_18] : memref<8x128xbf16, #tpu.memory_space<vmem>>, vector<8x128xbf16>
    tpu.vector_store %arg8[%c0_17, %c0_18], %25 {strides = array<i32>} : memref<8x128xbf16, #tpu.memory_space<vmem>>, vector<8x128xbf16>,
    return
  }
  func.func @transform_0(%arg0: i32) -> (i32, i32) {
    %c0_i32 = arith.constant 0 : i32
    %c0_i32_0 = arith.constant 0 : i32
    return %arg0, %c0_i32 : i32, i32
  }
  func.func @transform_1(%arg0: i32) -> (i32, i32) {
    %c0_i32 = arith.constant 0 : i32
    %c0_i32_0 = arith.constant 0 : i32
    %c0_i32_1 = arith.constant 0 : i32
    return %c0_i32, %c0_i32_0 : i32, i32
  }
  func.func @transform_2(%arg0: i32) -> (i32, i32) {
    %c0_i32 = arith.constant 0 : i32
    %c0_i32_0 = arith.constant 0 : i32
    %c0_i32_1 = arith.constant 0 : i32
    return %c0_i32, %c0_i32_0 : i32, i32
  }
  func.func @transform_3(%arg0: i32) -> (i32, i32) {
    %c0_i32 = arith.constant 0 : i32
    %c0_i32_0 = arith.constant 0 : i32
    %c0_i32_1 = arith.constant 0 : i32
    return %c0_i32, %c0_i32_0 : i32, i32
  }
  func.func @transform_4(%arg0: i32) -> (i32, i32) {
    %c0_i32 = arith.constant 0 : i32
    %c0_i32_0 = arith.constant 0 : i32
    %c0_i32_1 = arith.constant 0 : i32
    return %c0_i32, %c0_i32_0 : i32, i32
  }
  func.func @transform_5(%arg0: i32) -> (i32, i32) {
    %c0_i32 = arith.constant 0 : i32
    %c0_i32_0 = arith.constant 0 : i32
    %c0_i32_1 = arith.constant 0 : i32
    return %c0_i32, %c0_i32_0 : i32, i32
  }
  func.func @transform_6(%arg0: i32) -> (i32, i32) {
    %c0_i32 = arith.constant 0 : i32
    %c0_i32_0 = arith.constant 0 : i32
    %c0_i32_1 = arith.constant 0 : i32
    return %c0_i32, %c0_i32_0 : i32, i32
  }
  func.func @transform_7(%arg0: i32) -> (i32, i32) {
    %c0_i32 = arith.constant 0 : i32
    %c0_i32_0 = arith.constant 0 : i32
    return %arg0, %c0_i32 : i32, i32
  }
}

</mosaic_0001>

<bundles_post_ra>
// kernel: tpu_custom_call.1
= control target key start
LH: loop header
LB: loop body
LE: loop exit
PB: predicated region body
PF: predicated region fallthrough
CT: control target
= control target key end

     0   :  { %12 = vsyncpa [#allocation3], 0  ;;  %s1069_s0 = inlined_call_operand.hbm [shape: f32[2,32], index: 0, kind: input, shape index: {}]   ;;  %s1070_s1 = inlined_call_operand.hbm [shape: bf16[32,256], index: 1, kind: input, shape index: {}]   ;;  %s1071_s2 = inlined_call_operand.vmem [shape: f32[1,256], index: 2, kind: input, shape index: {}]   ;;  %s1072_s3 = inlined_call_operand.hbm [shape: bf16[256,256], index: 3, kind: input, shape index: {}]   ;;  %s1073_s4 = inlined_call_operand.vmem [shape: f32[1,256], index: 4, kind: input, shape index: {}]   ;;  %s1074_s5 = inlined_call_operand.hbm [shape: bf16[256,128], index: 5, kind: input, shape index: {}]   ;;  %s1075_s6 = inlined_call_operand.vmem [shape: f32[1,128], index: 6, kind: input, shape index: {}]   ;;  %s1076_s7 = inlined_call_operand.hbm [shape: bf16[2,128], index: 7, kind: output, shape index: {}]  }
   0x1   :  { %13 = vsyncpa [#allocation6], 0 }
   0x2   :  { %14 = vsyncpa [#allocation9], 0 }
   0x3   :  { %15 = vsyncpa [#allocation4], 0 }
   0x4   :  { %20 = vsyncadd [#allocation3], 96  ;;  %s932_s24 = smov [#allocation5]   ;;  %s814_s28 = scalar_lea.hbm %s1070_s1, 512 }
   0x5   :  { %s33_s25 = sshll.u32 %s932_s24, 4  ;;  %p815_p0 = scmp.ne.s32.totalorder %s1070_s1, %s814_s28  ;;  %s34_s25 = int_to_ptr.vmem [resolvable:$true] %s33_s25 }
   0x6   :  { %p818_p1 = scmp.lt.u32.totalorder %s814_s28, %s1070_s1 }
   0x8   :  { %p820_p2 = pnand %p818_p1, %p815_p0 }
   0xa   :  { %823 = shalt.err (!%p820_p2)
}
   0xb   :  { %s824_s10 = scalar_lea.vmem %s34_s25, 512  ;;  %p829_p4 = scmp.lt.s32.totalorder %s34_s25, %s34_s25 }
   0xc   :  { %p825_p3 = scmp.ne.s32.totalorder %s34_s25, %s824_s10  ;;  %p830_p5 = scmp.lt.s32.totalorder %s824_s10, %s824_s10 }
   0xe   :  { %p831_p6 = por %p830_p5, %p829_p4 }
  0x10   :  { %p832_p7 = pnand %p831_p6, %p825_p3 }
  0x12   :  { %835 = shalt.err (!%p832_p7)
}
  0x13   :  { %s933_s11 = smov 128   ;;  %s934_s12 = smov 8  }
  0x14   :  { %39 = dma.hbm_to_vmem [thread:$0]  %s1070_s1, 512, %s34_s25, [#allocation6], %s933_s11, %s933_s11, %s934_s12  }
  0x15   :  { %s935_s15 = smov [#allocation2]   ;;  %s836_s19 = scalar_lea.hbm %s1069_s0, 32 }
  0x16   :  { %s21_s16 = sshll.u32 %s935_s15, 4  ;;  %p837_p8 = scmp.ne.s32.totalorder %s1069_s0, %s836_s19  ;;  %s22_s16 = int_to_ptr.vmem [resolvable:$true] %s21_s16 }
  0x17   :  { %p840_p9 = scmp.lt.u32.totalorder %s836_s19, %s1069_s0 }
  0x19   :  { %p842_p10 = pnand %p840_p9, %p837_p8 }
  0x1b   :  { %845 = shalt.err (!%p842_p10)
}
  0x1c   :  { %s846_s24 = scalar_lea.vmem %s22_s16, 32  ;;  %s850_s1 = scalar_lea.vmem %s22_s16, 128 }
  0x1d   :  { %p847_p11 = scmp.ne.s32.totalorder %s22_s16, %s846_s24  ;;  %p851_p12 = scmp.lt.s32.totalorder %s22_s16, %s22_s16 }
  0x1e   :  { %p852_p13 = scmp.lt.s32.totalorder %s850_s1, %s846_s24 }
  0x20   :  { %p853_p0 = por %p852_p13, %p851_p12 }
  0x22   :  { %p854_p1 = pnand %p853_p0, %p847_p11 }
  0x24   :  { %857 = shalt.err (!%p854_p1)
}
  0x25   :  { %s936_s25 = smov 32   ;;  %s937_s26 = smov 2  }
  0x26   :  { %27 = dma.hbm_to_vmem [thread:$0]  %s1069_s0, 32, %s22_s16, [#allocation3], %s936_s25, %s936_s25, %s937_s26  }
  0x27   :  { %s938_s29 = smov [#allocation7]   ;;  %s939_s8 = smov [#allocation8]  }
  0x28   :  { %s47_s30 = sshll.u32 %s938_s29, 4  ;;  %s61_s9 = sshll.u32 %s939_s8, 4  ;;  %s48_s30 = int_to_ptr.vmem [resolvable:$true] %s47_s30  ;;  %s1014_s9 = int_to_ptr.vmem [resolvable:$true] %s61_s9 }
  0x29   :  { %s858_s14 = scalar_lea.hbm %s1072_s3, 4096 }
  0x2a   :  { %p859_p2 = scmp.ne.s32.totalorder %s1072_s3, %s858_s14  ;;  %p862_p3 = scmp.lt.u32.totalorder %s858_s14, %s1072_s3 }
  0x2c   :  { %p864_p4 = pnand %p862_p3, %p859_p2 }
  0x2e   :  { %867 = shalt.err (!%p864_p4)
}
  0x2f   :  { %s868_s0 = scalar_lea.vmem %s48_s30, 4096  ;;  %p873_p6 = scmp.lt.s32.totalorder %s48_s30, %s48_s30 }
  0x30   :  { %p869_p5 = scmp.ne.s32.totalorder %s48_s30, %s868_s0  ;;  %p874_p7 = scmp.lt.s32.totalorder %s868_s0, %s868_s0 }
  0x32   :  { %p875_p8 = por %p874_p7, %p873_p6 }
  0x34   :  { %p876_p9 = pnand %p875_p8, %p869_p5 }
  0x36   :  { %879 = shalt.err (!%p876_p9)
}
  0x37   :  { %53 = dma.hbm_to_vmem [thread:$0]  %s1072_s3, 4096, %s48_s30, [#allocation6], %s933_s11, %s933_s11, %s934_s12  }
  0x38   :  { %s880_s23 = scalar_lea.hbm %s1074_s5, 2048 }
  0x39   :  { %p881_p10 = scmp.ne.s32.totalorder %s1074_s5, %s880_s23  ;;  %p884_p11 = scmp.lt.u32.totalorder %s880_s23, %s1074_s5 }
  0x3b   :  { %p886_p12 = pnand %p884_p11, %p881_p10 }
  0x3d   :  { %889 = shalt.err (!%p886_p12)
}
  0x3e   :  { %s890_s27 = scalar_lea.vmem %s1014_s9, 2048  ;;  %p895_p0 = scmp.lt.s32.totalorder %s1014_s9, %s1014_s9 }
  0x3f   :  { %p891_p13 = scmp.ne.s32.totalorder %s1014_s9, %s890_s27  ;;  %p896_p1 = scmp.lt.s32.totalorder %s890_s27, %s890_s27 }
  0x41   :  { %p897_p2 = por %p896_p1, %p895_p0 }
  0x43   :  { %p898_p3 = pnand %p897_p2, %p891_p13 }
  0x45   :  { %901 = shalt.err (!%p898_p3)
}
  0x46   :  { %s940_s3 = smov 64   ;;  %s941_s11 = smov 4  }
  0x47   :  { %67 = dma.hbm_to_vmem [thread:$0]  %s1074_s5, 2048, %s1014_s9, [#allocation9], %s940_s3, %s940_s3, %s941_s11  }
  0x48   :  { %924 = dma.done.wait [#allocation3], 128  }
  0x49   :  { %925 = vsyncadd [#allocation3], 4294967168 }
  0x4a   :  { %926 = dma.done.wait [#allocation6], 4608  }
  0x4b   :  { %927 = vsyncadd [#allocation6], 4294962688 }
  0x4c   :  { %928 = dma.done.wait [#allocation9], 2048  }
  0x4d   :  { %929 = vsyncadd [#allocation9], 4294965248  ;;  %v942_v0 = vmov 0   ;;  %v744_v1 = vld [vmem:[#allocation5 + $0x4] ss:$8 sps:$4 sm:$0xff]   ;;  %v83_v5 = vld [vmem:[#allocation2] sm:$0xff]  ;;  %v91_v50 = vlaneseq }
  0x4e   :  { %157 = vmatprep.mubr.bf16.mxu0 %v942_v0  ;;  %v746_v2 = vld [vmem:[#allocation5] ss:$8 sps:$4 sm:$0xff]   ;;  %125 = vmatprep.subr.bf16.mxu0 %v744_v1  ;;  %v747_v3 = vld [vmem:[#allocation5 + $0x14] ss:$8 sps:$4 sm:$0xff]   ;;  %v749_v4 = vld [vmem:[#allocation5 + $0x10] ss:$8 sps:$4 sm:$0xff]   ;;  %v84_v9 = vpack.c.bf16 %v83_v5, %v83_v5 }
  0x4f   :  { %126 = vmatpush1.bf16.msra.mxu0 %v746_v2  ;;  %v750_v6 = vld [vmem:[#allocation7 + $0x4] ss:$8 sps:$4 sm:$0xff]   ;;  %v752_v7 = vld [vmem:[#allocation7] ss:$8 sps:$4 sm:$0xff]   ;;  %v753_v8 = vld [vmem:[#allocation7 + $0x14] ss:$8 sps:$4 sm:$0xff]  }
  0x50   :  { %127 = vmatprep.subr.bf16.mxu0 %v747_v3  ;;  %376 = vmatprep.subr.bf16.mxu1 %v750_v6  ;;  %v755_v10 = vld [vmem:[#allocation7 + $0x10] ss:$8 sps:$4 sm:$0xff]   ;;  %vm121_vm0 = vcmask 261120   ;;  %v756_v11 = vld [vmem:[#allocation7 + $0x24] ss:$8 sps:$4 sm:$0xff]   ;;  %v92_v51 = vshrl.u32 %v91_v50, 7 }
  0x51   :  { %377 = vmatpush1.bf16.msra.mxu1 %v752_v7  ;;  %v758_v12 = vld [vmem:[#allocation7 + $0x20] ss:$8 sps:$4 sm:$0xff]   ;;  %v759_v13 = vld [vmem:[#allocation7 + $0x34] ss:$8 sps:$4 sm:$0xff]   ;;  %v761_v14 = vld [vmem:[#allocation7 + $0x30] ss:$8 sps:$4 sm:$0xff]  }
  0x52   :  { %378 = vmatprep.subr.bf16.mxu1 %v753_v8  ;;  %v762_v15 = vld [vmem:[#allocation7 + $0x44] ss:$8 sps:$4 sm:$0xff]   ;;  %v764_v16 = vld [vmem:[#allocation7 + $0x40] ss:$8 sps:$4 sm:$0xff]   ;;  %v765_v17 = vld [vmem:[#allocation7 + $0x54] ss:$8 sps:$4 sm:$0xff]  }
  0x53   :  { %128 = vmatpush1.bf16.msra.mxu0 %v749_v4  ;;  %v767_v18 = vld [vmem:[#allocation7 + $0x50] ss:$8 sps:$4 sm:$0xff]   ;;  %v768_v19 = vld [vmem:[#allocation7 + $0x64] ss:$8 sps:$4 sm:$0xff]   ;;  %v770_v20 = vld [vmem:[#allocation7 + $0x60] ss:$8 sps:$4 sm:$0xff]  }
  0x54   :  { %v771_v21 = vld [vmem:[#allocation7 + $0x74] ss:$8 sps:$4 sm:$0xff]   ;;  %v773_v22 = vld [vmem:[#allocation7 + $0x70] ss:$8 sps:$4 sm:$0xff]   ;;  %v774_v23 = vld [vmem:[#allocation7 + $0x84] ss:$8 sps:$4 sm:$0xff]  }
  0x55   :  { %379 = vmatpush1.bf16.msra.mxu1 %v755_v10  ;;  %v776_v24 = vld [vmem:[#allocation7 + $0x80] ss:$8 sps:$4 sm:$0xff]   ;;  %v777_v25 = vld [vmem:[#allocation7 + $0x94] ss:$8 sps:$4 sm:$0xff]   ;;  %v779_v26 = vld [vmem:[#allocation7 + $0x90] ss:$8 sps:$4 sm:$0xff]  }
  0x56   :  { %655 = vmatmul.mubr.msk.bf16.vlgmr.msra.gmra.mrb[0].mxu0 %vm121_vm0, %v84_v9  ;;  %380 = vmatprep.subr.bf16.mxu1 %v756_v11  ;;  %v780_v27 = vld [vmem:[#allocation7 + $0xa4] ss:$8 sps:$4 sm:$0xff]   ;;  %v782_v28 = vld [vmem:[#allocation7 + $0xa0] ss:$8 sps:$4 sm:$0xff]   ;;  %v783_v29 = vld [vmem:[#allocation7 + $0xb4] ss:$8 sps:$4 sm:$0xff]  }
  0x57   :  { %v785_v30 = vld [vmem:[#allocation7 + $0xb0] ss:$8 sps:$4 sm:$0xff]   ;;  %v786_v31 = vld [vmem:[#allocation7 + $0xc4] ss:$8 sps:$4 sm:$0xff]   ;;  %v788_v32 = vld [vmem:[#allocation7 + $0xc0] ss:$8 sps:$4 sm:$0xff]  }
  0x58   :  { %v789_v33 = vld [vmem:[#allocation7 + $0xd4] ss:$8 sps:$4 sm:$0xff]   ;;  %v791_v34 = vld [vmem:[#allocation7 + $0xd0] ss:$8 sps:$4 sm:$0xff]   ;;  %v792_v35 = vld [vmem:[#allocation7 + $0xe4] ss:$8 sps:$4 sm:$0xff]  }
  0x59   :  { %381 = vmatpush1.bf16.msra.mxu1 %v758_v12  ;;  %v794_v36 = vld [vmem:[#allocation7 + $0xe0] ss:$8 sps:$4 sm:$0xff]   ;;  %v795_v37 = vld [vmem:[#allocation7 + $0xf4] ss:$8 sps:$4 sm:$0xff]   ;;  %v797_v38 = vld [vmem:[#allocation7 + $0xf0] ss:$8 sps:$4 sm:$0xff]  }
  0x5a   :  { %382 = vmatprep.subr.bf16.mxu1 %v759_v13  ;;  %v798_v39 = vld [vmem:[#allocation8 + $0x40] sm:$0xff]   ;;  %v800_v41 = vld [vmem:[#allocation8 + $0x48] sm:$0xff]   ;;  %v802_v43 = vld [vmem:[#allocation8 + $0x50] sm:$0xff]   ;;  %v93_v52 = vsub.s32 0, %v92_v51  ;;  %v97_v54 = vsub.s32 1, %v92_v51 }
  0x5b   :  { %v799_v40 = vld [vmem:[#allocation8] sm:$0xff]   ;;  %707 = vmatprep.subr.bf16.mxu0 %v798_v39  ;;  %v801_v42 = vld [vmem:[#allocation8 + $0x8] sm:$0xff]   ;;  %v803_v44 = vld [vmem:[#allocation8 + $0x10] sm:$0xff]  }
  0x5c   :  { %708 = vmatpush3.bf16.msra.mxu0 %v799_v40  ;;  %v804_v45 = vld [vmem:[#allocation8 + $0x58] sm:$0xff]   ;;  %v806_v47 = vld [vmem:[#allocation8 + $0x60] sm:$0xff]   ;;  %v808_v49 = vld [vmem:[#allocation8 + $0x68] sm:$0xff]  }
  0x5d   :  { %383 = vmatpush1.bf16.msra.mxu1 %v761_v14  ;;  %709 = vmatprep.subr.bf16.mxu0 %v800_v41  ;;  %v805_v46 = vld [vmem:[#allocation8 + $0x18] sm:$0xff]   ;;  %v807_v48 = vld [vmem:[#allocation8 + $0x20] sm:$0xff]   ;;  %v809_v5 = vld [vmem:[#allocation8 + $0x28] sm:$0xff]  }
  0x5e   :  { %384 = vmatprep.subr.bf16.mxu1 %v762_v15  ;;  %v89_v53 = vld [vmem:[%s1071_s2] sm:$0x3]  ;;  %v810_v6 = vld [vmem:[#allocation8 + $0x70] sm:$0xff]  }
  0x5f   :  { %v94_v55 = vrot.slane %v89_v53, %v93_v52  ;;  %v98_v56 = vrot.slane %v89_v53, %v97_v54  ;;  %v811_v7 = vld [vmem:[#allocation8 + $0x30] sm:$0xff]   ;;  %v812_v8 = vld [vmem:[#allocation8 + $0x78] sm:$0xff]  }
  0x60   :  { %710 = vmatpush3.bf16.msra.mxu0 %v801_v42  ;;  %v813_v9 = vld [vmem:[#allocation8 + $0x38] sm:$0xff]  }
  0x61   :  { %385 = vmatpush1.bf16.msra.mxu1 %v764_v16  ;;  %711 = vmatprep.subr.bf16.mxu0 %v802_v43  ;;  %v204_v10 = vld [vmem:[%s1073_s4] sm:$0x3] }
  0x62   :  { %386 = vmatprep.subr.bf16.mxu1 %v765_v17  ;;  %v209_v11 = vrot.slane %v204_v10, %v93_v52  ;;  %v213_v12 = vrot.slane %v204_v10, %v97_v54 }
  0x64   :  { %712 = vmatpush3.bf16.msra.mxu0 %v803_v44 }
  0x65   :  { %387 = vmatpush1.bf16.msra.mxu1 %v767_v18  ;;  %713 = vmatprep.subr.bf16.mxu0 %v804_v45 }
  0x66   :  { %388 = vmatprep.subr.bf16.mxu1 %v768_v19 }
  0x68   :  { %714 = vmatpush3.bf16.msra.mxu0 %v805_v46 }
  0x69   :  { %389 = vmatpush1.bf16.msra.mxu1 %v770_v20  ;;  %715 = vmatprep.subr.bf16.mxu0 %v806_v47 }
  0x6a   :  { %390 = vmatprep.subr.bf16.mxu1 %v771_v21 }
  0x6c   :  { %716 = vmatpush3.bf16.msra.mxu0 %v807_v48 }
  0x6d   :  { %391 = vmatpush1.bf16.msra.mxu1 %v773_v22  ;;  %717 = vmatprep.subr.bf16.mxu0 %v808_v49 }
  0x6e   :  { %392 = vmatprep.subr.bf16.mxu1 %v774_v23 }
  0x70   :  { %718 = vmatpush3.bf16.msra.mxu0 %v809_v5 }
  0x71   :  { %393 = vmatpush1.bf16.msra.mxu1 %v776_v24  ;;  %719 = vmatprep.subr.bf16.mxu0 %v810_v6 }
  0x72   :  { %394 = vmatprep.subr.bf16.mxu1 %v777_v25  ;;  %v943_v25 = vmov 1966171168  }
  0x74   :  { %720 = vmatpush3.bf16.msra.mxu0 %v811_v7 }
  0x75   :  { %395 = vmatpush1.bf16.msra.mxu1 %v779_v26  ;;  %721 = vmatprep.subr.bf16.mxu0 %v812_v8  ;;  %v601_v26 = vunpack.c.l.s4 %v943_v25 }
  0x76   :  { %396 = vmatprep.subr.bf16.mxu1 %v780_v27 }
  0x78   :  { %722 = vmatpush3.bf16.msra.mxu0 %v813_v9 }
  0x79   :  { %397 = vmatpush1.bf16.msra.mxu1 %v782_v28  ;;  %v602_v28 = vunpack.c.0.s8 %v601_v26 }
  0x7a   :  { %398 = vmatprep.subr.bf16.mxu1 %v783_v29  ;;  %v688_v29 = vld [vmem:[%s1075_s6] ss:$0 sm:$0xff] }
  0x7d   :  { %399 = vmatpush1.bf16.msra.mxu1 %v785_v30 }
  0x7e   :  { %400 = vmatprep.subr.bf16.mxu1 %v786_v31 }
  0x81   :  { %401 = vmatpush1.bf16.msra.mxu1 %v788_v32 }
  0x82   :  { %402 = vmatprep.subr.bf16.mxu1 %v789_v33 }
  0x85   :  { %403 = vmatpush1.bf16.msra.mxu1 %v791_v34 }
  0x86   :  { %404 = vmatprep.subr.bf16.mxu1 %v792_v35  ;;  %v605_v35 = vsub.s32 %v602_v28, %v92_v51 }
  0x89   :  { %405 = vmatpush1.bf16.msra.mxu1 %v794_v36 }
  0x8a   :  { %406 = vmatprep.subr.bf16.mxu1 %v795_v37 }
  0x8d   :  { %407 = vmatpush1.bf16.msra.mxu1 %v797_v38 }
 0x129   :  { %v159_v57 = vpop.f32.mrb[0].mxu0 }
 0x12a   :  { %v160_v58 = vadd.f32 %v159_v57, %v94_v55  ;;  %v161_v59 = vpop.f32.mrb[1].mxu0 }
 0x12b   :  { %v162_v60 = vadd.f32 %v161_v59, %v98_v56  ;;  %v163_v61 = vpop.f32.mrb[2].mxu0 }
 0x12c   :  { %v166_v62 = vmul.f32 0.01, %v160_v58  ;;  %v164_v63 = vpop.f32.mrb[3].mxu0 }
 0x12d   :  { %v167_v0 = vmul.f32 0.01, %v162_v60 }
 0x12e   :  { %v168_v1 = vmax.f32 %v160_v58, %v166_v62 }
 0x12f   :  { %v169_v2 = vmax.f32 %v162_v60, %v167_v0 }
 0x130   :  { %v170_v4 = vpack.c.bf16 %v168_v1, %v168_v1 }
 0x131   :  { %v171_v3 = vpack.c.bf16 %v169_v2, %v169_v2 }
 0x133   :  { %408 = vmatprep.mubr.bf16.mxu1 %v171_v3 }
 0x134   :  { %409 = vmatmul.mubr.bf16.vlgmr.msra.gmra.mrb[0].mxu1 %v170_v4 }
 0x207   :  { %v410_v13 = vpop.f32.mrb[0].mxu1 }
 0x208   :  { %v411_v14 = vadd.f32 %v410_v13, %v209_v11  ;;  %v412_v15 = vpop.f32.mrb[1].mxu1 }
 0x209   :  { %v413_v16 = vadd.f32 %v412_v15, %v213_v12  ;;  %v414_v17 = vpop.f32.mrb[2].mxu1 }
 0x20a   :  { %v417_v18 = vmul.f32 0.01, %v411_v14  ;;  %v415_v19 = vpop.f32.mrb[3].mxu1 }
 0x20b   :  { %v418_v20 = vmul.f32 0.01, %v413_v16 }
 0x20c   :  { %v419_v21 = vmax.f32 %v411_v14, %v417_v18 }
 0x20d   :  { %v420_v22 = vmax.f32 %v413_v16, %v418_v20 }
 0x20e   :  { %v421_v24 = vpack.c.bf16 %v419_v21, %v419_v21 }
 0x20f   :  { %v422_v23 = vpack.c.bf16 %v420_v22, %v420_v22 }
 0x211   :  { %590 = vmatprep.mubr.bf16.mxu0 %v422_v23 }
 0x212   :  { %591 = vmatmul.mubr.bf16.vlgmr.msra.gmra.mrb[4].mxu0 %v421_v24 }
 0x2e5   :  { %v723_v27 = vpop.f32.mrb[4].mxu0 }
 0x2e6   :  { %v724_v30 = vpop.f32.mrb[5].mxu0 }
 0x2e7   :  { %v725_v31 = vadd.f32 %v724_v30, %v723_v27  ;;  %v726_v32 = vpop.f32.mrb[6].mxu0 }
 0x2e8   :  { %v727_v33 = vpop.f32.mrb[7].mxu0 }
 0x2e9   :  { %v593_v34 = vadd.f32 %v725_v31, %v688_v29 }
 0x2eb   :  { %v598_v36 = vpack.c.bf16 %v593_v34, %v593_v34 }
 0x2ed   :  { %v606_v37 = vrot.slane %v598_v36, %v605_v35 }
 0x2ef   :  { %v607_v38 = vcombine.high %v606_v37, %v606_v37  ;;  %v614_v39 = vrot.slane %v606_v37, %v605_v35  ;;  %705 = vst.sshfl [vmem:[#allocation10] sm:$0x1 pattern:$0x73625140] %v606_v37 }
 0x2f1   :  { %v621_v40 = vrot.slane %v607_v38, %v605_v35  ;;  %v622_v41 = vcombine.high %v614_v39, %v614_v39  ;;  %706 = vst.sshfl [vmem:[#allocation10 + $0x1] sm:$0x1 pattern:$0x73625140] %v607_v38 }
 0x2f3   :  { %v623_v42 = vcombine.high %v621_v40, %v621_v40  ;;  %630 = vst [vmem:[#allocation10 + $0x2] sm:$0x1] %v622_v41 }
 0x2f5   :  { %631 = vst [vmem:[#allocation10 + $0x3] sm:$0x1] %v623_v42 }
 0x2f6   :  { %636 = vsyncadd [#allocation4], 48  ;;  %s944_s9 = smov [#allocation10]  }
 0x2f7   :  { %s637_s6 = sshll.u32 %s944_s9, 4  ;;  %s638_s6 = int_to_ptr.vmem [resolvable:$true] %s637_s6 }
 0x2f8   :  { %s902_s10 = scalar_lea.vmem %s638_s6, 16  ;;  %s906_s13 = scalar_lea.vmem %s638_s6, 64 }
 0x2f9   :  { %p903_p4 = scmp.ne.s32.totalorder %s638_s6, %s902_s10  ;;  %p907_p5 = scmp.lt.s32.totalorder %s638_s6, %s638_s6 }
 0x2fa   :  { %p908_p6 = scmp.lt.s32.totalorder %s906_s13, %s902_s10 }
 0x2fc   :  { %p909_p7 = por %p908_p6, %p907_p5 }
 0x2fe   :  { %p910_p8 = pnand %p909_p7, %p903_p4 }
 0x300   :  { %913 = shalt.err (!%p910_p8)
}
 0x301   :  { %s914_s17 = scalar_lea.hbm %s1076_s7, 16 }
 0x302   :  { %p915_p9 = scmp.ne.s32.totalorder %s1076_s7, %s914_s17  ;;  %p918_p10 = scmp.lt.u32.totalorder %s914_s17, %s1076_s7 }
 0x304   :  { %p920_p11 = pnand %p918_p10, %p915_p9 }
 0x306   :  { %923 = shalt.err (!%p920_p11)
}
 0x307   :  { %s945_s20 = smov 16   ;;  %s946_s21 = smov 1  }
 0x308   :  { %643 = dma.vmem_to_hbm [thread:$0]  %s638_s6, 16, %s1076_s7, [#allocation4], %s945_s20, %s945_s20, %s946_s21  }
 0x309   :  { %930 = dma.done.wait [#allocation4], 64  }
 0x30a   :  { %931 = vsyncadd [#allocation4], 4294967232 }
 0x30b   :  { %647 = vsyncpa [#allocation3], 1 }
 0x30c   :  { %648 = vsyncpa [#allocation6], 1 }
 0x30d   :  { %649 = vsyncpa [#allocation9], 1 }
 0x30e   :  { %650 = vsyncpa [#allocation4], 1 }

</bundles_post_ra>
